<compile_context>
chip_gen: v7x
topology: tpu7x:2x2x1
jax: 0.10.0
libtpu: 0.0.40
codegen_flags: <defaults>
</compile_context>

<pallas_src>
import jax
import jax.numpy as jnp
from jax.experimental import pallas as pl
from jax.experimental.pallas import tpu as pltpu


def _round_up(x, m):
    return ((x + m - 1) // m) * m


def _round_down(x, m):
    return (x // m) * m


def _sp_attn_kernel(center_ref, x_ref, o_ref):
    # center_ref: (1, c)        -- per-batch center pixel across channels
    # x_ref/o_ref: (c, TILE_HW) -- one spatial tile for one batch element
    x = x_ref[...]
    # Channel reduction on the MXU with f32 accumulation. Per-lane independent,
    # so a partial (masked) tail block is safe.
    sim = jnp.dot(center_ref[...], x, preferred_element_type=jnp.float32)  # (1, TILE_HW)
    o_ref[...] = (sim * x).astype(o_ref.dtype)


def sing_point_attention(x, *, target_block_bytes=2 << 20, vmem_cap_bytes=32 << 20):
    """x: (bs, c, h, w) -> (bs, c, h, w); matches the PyTorch module forward."""
    bs, c, h, w = x.shape
    hw = h * w
    center_idx = (h // 2) * w + (w // 2)
    itemsize = jnp.dtype(x.dtype).itemsize
    lane = 128
    # Physical sublane packing: 8 rows for f32, 16 for bf16, 32 for int8.
    c_pad = _round_up(c, max(8, 32 // itemsize))
    bytes_per_lane = c_pad * itemsize

    x_flat = x.reshape(bs, c, hw)                         # free (contiguous reshape)
    center = x_flat[:, :, center_idx].reshape(bs, 1, c)   # (bs, 1, c), hoisted once

    # ---- Spatial (lane) tile size from a byte budget -----------------------
    # tile_hw is either a multiple of 128 (partial tail block allowed) or the
    # full spatial extent; big blocks keep the DMA engine near the roofline.
    tile_budget = max(lane, _round_down(target_block_bytes // bytes_per_lane, lane))
    tile_hw = hw if hw <= tile_budget else tile_budget

    # ---- Guarantee >=2 grid steps (v7x has 2 TensorCores per chip) ----------
    if bs == 1 and tile_hw >= hw and hw > lane:
        tile_hw = max(lane, _round_down(hw // 2, lane))

    # ---- Fit double-buffered x/out blocks under the VMEM cap ----------------
    slack = 2 << 20
    center_bytes = 2 * 8 * _round_up(c, lane) * itemsize        # tiny resident block
    max_tile_bytes = max(lane * bytes_per_lane,
                         (vmem_cap_bytes - center_bytes - slack) // 4)
    if bytes_per_lane * tile_hw > max_tile_bytes:
        tile_hw = max(lane, _round_down(max_tile_bytes // bytes_per_lane, lane))

    n_spatial = pl.cdiv(hw, tile_hw)
    tile_bytes = bytes_per_lane * tile_hw
    vmem_limit = min(vmem_cap_bytes,
                     max(4 * tile_bytes + center_bytes + slack, 16 << 20))

    out_flat = pl.pallas_call(
        _sp_attn_kernel,
        out_shape=jax.ShapeDtypeStruct((bs, c, hw), x.dtype),
        grid_spec=pltpu.PrefetchScalarGridSpec(
            num_scalar_prefetch=0,
            grid=(bs, n_spatial),
            in_specs=[
                # center: (bs, 1, c); leading batch dim squeezed in-kernel,
                # resident across all spatial tiles of a batch element.
                pl.BlockSpec((None, 1, c), lambda b, s: (b, 0, 0)),
                # x: (bs, c, hw), tiled along the spatial (lane) axis.
                pl.BlockSpec((None, c, tile_hw), lambda b, s: (b, 0, s)),
            ],
            out_specs=pl.BlockSpec((None, c, tile_hw), lambda b, s: (b, 0, s)),
        ),
        compiler_params=pltpu.CompilerParams(
            dimension_semantics=("parallel", "parallel"),
            vmem_limit_bytes=vmem_limit,
        ),
        cost_estimate=pl.CostEstimate(
            flops=3 * bs * c * hw,
            transcendentals=0,
            bytes_accessed=2 * bs * c * hw * itemsize,
        ),
    )(center, x_flat)

    return out_flat.reshape(bs, c, h, w)


def _reference(x):
    bs, c, h, w = x.shape
    center = x[:, :, h // 2:h // 2 + 1, w // 2:w // 2 + 1]
    similarity = jnp.sum(center * x, axis=1, keepdims=True)
    return similarity * x


if __name__ == "__main__":
    k0, k1, k2 = jax.random.split(jax.random.PRNGKey(0), 3)

    # 1) Main shape implied by the module spec.
    x1 = jax.random.normal(k0, (2, 4, 16, 16), dtype=jnp.float32)
    o1 = jax.block_until_ready(sing_point_attention(x1))
    assert o1.shape == x1.shape
    assert jnp.allclose(o1, _reference(x1), atol=1e-5, rtol=1e-5), "mismatch (main)"

    # 2) Ragged spatial extent with a forced-small tile: hw=400 with 128-lane
    #    tiles -> partial (masked) tail block, no pad / no slice in the wrapper.
    x2 = jax.random.normal(k1, (1, 8, 20, 20), dtype=jnp.float32)
    o2 = jax.block_until_ready(sing_point_attention(x2, target_block_bytes=4096))
    assert o2.shape == x2.shape
    assert jnp.allclose(o2, _reference(x2), atol=1e-5, rtol=1e-5), "mismatch (ragged)"

    # 3) bs == 1 path: tile is halved so the grid has >=2 steps (v7x 2-TC).
    x3 = jax.random.normal(k2, (1, 4, 16, 16), dtype=jnp.float32)
    o3 = jax.block_until_ready(sing_point_attention(x3))
    assert o3.shape == x3.shape
    assert jnp.allclose(o3, _reference(x3), atol=1e-5, rtol=1e-5), "mismatch (bs=1)"

    print("KERNEL_OK")
</pallas_src>

<mosaic_0001>
module attributes {stable_mosaic.version = 11 : i64} {
  func.func @_sp_attn_kernel(%arg0: i32, %arg1: i32, %arg2: memref<1x1x4xf32, #tpu.memory_space<vmem>>, %arg3: memref<1x4x256xf32, #tpu.memory_space<vmem>>, %arg4: memref<1x4x256xf32, #tpu.memory_space<vmem>>) attributes {dimension_semantics = [#tpu.dimension_semantics<parallel>, #tpu.dimension_semantics<parallel>], iteration_bounds = array<i64: 2, 1>, scalar_prefetch = 0 : i64, scratch_operands = 0 : i64, tpu.core_type = #tpu.core_type<tc>, window_params = [{transform_indices = @transform_0, window_bounds = array<i64: 1, 1, 4>}, {transform_indices = @transform_1, window_bounds = array<i64: 1, 4, 256>}, {transform_indices = @transform_2, window_bounds = array<i64: 1, 4, 256>}]} {
    %c0 = arith.constant 0 : index
    %c0_0 = arith.constant 0 : index
    %c0_1 = arith.constant 0 : index
    %0 = vector.load %arg3[%c0, %c0_0, %c0_1] : memref<1x4x256xf32, #tpu.memory_space<vmem>>, vector<1x4x256xf32>
    %1 = vector.shape_cast %0 : vector<1x4x256xf32> to vector<4x256xf32>
    %c0_2 = arith.constant 0 : index
    %c0_3 = arith.constant 0 : index
    %c0_4 = arith.constant 0 : index
    %2 = vector.load %arg2[%c0_2, %c0_3, %c0_4] : memref<1x1x4xf32, #tpu.memory_space<vmem>>, vector<1x1x4xf32>
    %3 = vector.shape_cast %2 : vector<1x1x4xf32> to vector<1x4xf32>
    %cst = arith.constant dense<0.000000e+00> : vector<1x256xf32>
    %4 = tpu.matmul %3, %1, %cst {dimension_numbers = #tpu.dot_dimension_numbers<[1], [0], [0], [1], [0, 0, 1, 1], [], []>} : vector<1x4xf32>, vector<4x256xf32>, vector<1x256xf32> -> vector<1x256xf32>
    %5 = vector.broadcast %4 : vector<1x256xf32> to vector<4x256xf32>
    %6 = arith.mulf %5, %1 : vector<4x256xf32>
    %c0_5 = arith.constant 0 : index
    %c0_6 = arith.constant 0 : index
    %c0_7 = arith.constant 0 : index
    %7 = vector.load %arg4[%c0_5, %c0_6, %c0_7] : memref<1x4x256xf32, #tpu.memory_space<vmem>>, vector<1x4x256xf32>
    %8 = vector.shape_cast %7 : vector<1x4x256xf32> to vector<4x256xf32>
    %9 = vector.shape_cast %6 : vector<4x256xf32> to vector<1x4x256xf32>
    tpu.vector_store %arg4[%c0_5, %c0_6, %c0_7], %9 {strides = array<i32>} : memref<1x4x256xf32, #tpu.memory_space<vmem>>, vector<1x4x256xf32>,
    return
  }
  func.func @transform_0(%arg0: i32, %arg1: i32) -> (i32, i32, i32) {
    %c0_i32 = arith.constant 0 : i32
    %c0_i32_0 = arith.constant 0 : i32
    %c0_i32_1 = arith.constant 0 : i32
    return %arg0, %c0_i32, %c0_i32_0 : i32, i32, i32
  }
  func.func @transform_1(%arg0: i32, %arg1: i32) -> (i32, i32, i32) {
    %c0_i32 = arith.constant 0 : i32
    %c0_i32_0 = arith.constant 0 : i32
    return %arg0, %c0_i32, %arg1 : i32, i32, i32
  }
  func.func @transform_2(%arg0: i32, %arg1: i32) -> (i32, i32, i32) {
    %c0_i32 = arith.constant 0 : i32
    %c0_i32_0 = arith.constant 0 : i32
    return %arg0, %c0_i32, %arg1 : i32, i32, i32
  }
}

</mosaic_0001>

<bundles_post_ra>
// kernel: tpu_custom_call.1
= control target key start
LH: loop header
LB: loop body
LE: loop exit
PB: predicated region body
PF: predicated region fallthrough
CT: control target
= control target key end

     0   :  { %7 = vsyncpa [#allocation3], 0  ;;  %s909_s0 = inlined_call_operand.hbm [shape: f32[2,1,4], index: 0, kind: input, shape index: {}]   ;;  %s910_s1 = inlined_call_operand.hbm [shape: f32[2,4,256], index: 1, kind: input, shape index: {}]   ;;  %s911_s2 = inlined_call_operand.hbm [shape: f32[2,4,256], index: 2, kind: output, shape index: {}]  }
   0x1   :  { %9 = vsyncpa [#allocation3 + $0x1], 0 }
   0x2   :  { %10 = vsyncpa [#allocation6], 0 }
   0x3   :  { %12 = vsyncpa [#allocation6 + $0x1], 0 }
   0x4   :  { %13 = vsyncpa [#allocation4], 0 }
   0x5   :  { %15 = vsyncpa [#allocation4 + $0x1], 0  ;;  %s692_s9 = smov 0   ;;  %s694_s10 = smov 0  }
   0x6   :  { %s696_s11 = smov 0   ;;  %s698_s12 = smov 0  }
   0x7   :  { %s700_s13 = smov 0   ;;  %s702_s14 = smov 0  }
   0x8 LB: > { %s435_s15 = sadd.s32 4294967295, %s671_s14   ;;  %s436_s16 = sadd.s32 4294967294, %s671_s14   ;;  %s671_s14 = sphi %s702_s14, %s21_s14   ;;  %s667_s13 = sphi %s700_s13, %s931_s13   ;;  %s663_s12 = sphi %s698_s12, %s930_s12   ;;  %s659_s11 = sphi %s696_s11, %s929_s11   ;;  %s655_s10 = sphi %s694_s10, %s928_s10   ;;  %s651_s9 = sphi %s692_s9, %s927_s9  }
   0x9   : > { %s33_s17 = sadd.s32 1, %s667_s13  ;;  %s40_s18 = sadd.s32 1, %s659_s11 }
   0xa   : > { %p35_p0 = scmp.ge.s32.totalorder %s33_s17, 2  ;;  %p47_p1 = scmp.ne.s32.totalorder %s659_s11, %s655_s10 }
   0xb   : > { %p48_p2 = scmp.eq.s32.totalorder %s671_s14, 0  ;;  %p53_p3 = scmp.ne.s32.totalorder %s655_s10, %s651_s9 }
   0xc   : > { %s933_s17 = smov (%p35_p0, %s33_s17), 0  ;;  %p54_p5 = scmp.eq.s32.totalorder %s435_s15, 0 }
   0xd   : > { %p733_p4 = por %p48_p2, %p47_p1  ;;  %s37_s20 = ssub.s32 %s667_s13, %s933_s17 }
   0xe   : > { %p107_p6 = scmp.eq.s32.totalorder %s435_s15, 1  ;;  %p38_p7 = scmp.eq.s32.totalorder %s37_s20, 0 }
   0xf   : > { %p739_p8 = por %p54_p5, %p53_p3  ;;  %p113_p10 = scmp.eq.s32.totalorder %s436_s16, 1 }
  0x10   : > { %p743_p9 = por %p107_p6, %p47_p1  ;;  %p473_p13 = scmp.lt.s32.totalorder %s671_s14, 2 }
  0x11   : > { %s915_s21 = scalar_select %p739_p8, 1, 0 }
  0x12   : > { %s916_s22 = scalar_select %p743_p9, 1, 0 }
  0x13   : > { %s748_s23 = scalar_select %p38_p7, %s659_s11, %s40_s18  }
  0x14   : > { %p750_p11 = por %p113_p10, %p53_p3  ;;  %s757_s25 = sand.u32 1, %s659_s11  }
  0x15   : > { %s439_s26 = sshll.u32 %s667_s13, 4  ;;  %s136_s27 = scalar_lea.vmem [#allocation2], %s757_s25 }
  0x16   : > { %s917_s24 = scalar_select %p750_p11, 1, 0 }
  0x17   : > { %s143_s28 = sshll.u32 %s136_s27, 4  ;;  %s764_s3 = scalar_lea.hbm %s909_s0, %s439_s26  ;;  %s766_s28 = int_to_ptr.vmem [resolvable:$true] %s143_s28 }
  0x18   : > { %p770_p0 = pnand %p473_p13, %p733_p4  ;;  %s440_s5 = sshll.u32 %s757_s25, 3 }
  0x19   : > { %s134_s6 = scalar_lea.sflag [#allocation3], %s757_s25  ;;  %s525_s7 = scalar_lea.hbm %s764_s3, 16 }
  0x1a   : > { %p526_p3 = scmp.ne.s32.totalorder %s764_s3, %s525_s7  ;;  %p527_p5 = pneg %p770_p0 }
  0x1b   : > { %s530_s16 = scalar_lea.hbm %s909_s0, 32  ;;  %p531_p4 = scmp.lt.u32.totalorder %s764_s3, %s909_s0 }
  0x1c   : > { %p528_p6 = pnand %p527_p5, %p526_p3  ;;  %p532_p10 = scmp.lt.u32.totalorder %s530_s16, %s525_s7 }
  0x1d   : > { %p534_p12 = scmp.lt.u32.totalorder %s525_s7, %s764_s3 }
  0x1e   : > { %p529_p7 = pneg %p528_p6  ;;  %p533_p13 = por %p532_p10, %p531_p4 }
  0x20   : > { %p535_p1 = por %p534_p12, %p533_p13 }
  0x22   : > { %p536_p2 = pnand %p535_p1, %p529_p7 }
  0x24   : > { %539 = shalt.err (!%p536_p2)
}
  0x25   : > { %s540_s20 = scalar_lea.vmem %s766_s28, 16  ;;  %s673_s26 = smov [#allocation2]  }
  0x26   : > { %p541_p3 = scmp.ne.s32.totalorder %s766_s28, %s540_s20  ;;  %s545_s27 = sshll.u32 %s673_s26, 4  ;;  %s546_s27 = int_to_ptr.vmem [resolvable:$false] %s545_s27 }
  0x27   : > { %s547_s29 = scalar_lea.vmem %s546_s27, 32  ;;  %p548_p9 = scmp.lt.s32.totalorder %s766_s28, %s546_s27 }
  0x28   : > { %p543_p6 = pnand %p541_p3, %p527_p5  ;;  %p549_p4 = scmp.lt.s32.totalorder %s547_s29, %s540_s20 }
  0x2a   : > { %p544_p11 = pneg %p543_p6  ;;  %p550_p10 = por %p549_p4, %p548_p9 }
  0x2c   : > { %p551_p12 = pnand %p550_p10, %p544_p11 }
  0x2e   : > { %554 = shalt.err (!%p551_p12)
}
  0x2f   : > { %465 = dma.hbm_to_vmem [thread:$0]  (!%p770_p0), %s764_s3, 16, %s766_s28, %s134_s6  }
  0x30   : > { %p919_p1 = scmp.lt.s32.totalorder %s671_s14, 3  ;;  %p920_p2 = scmp.ge.s32.totalorder %s671_s14, 1 }
  0x31   : > { %s454_s7 = sshll.u32 %s667_s13, 7  ;;  %s154_s8 = scalar_lea.vmem [#allocation5], %s440_s5 }
  0x32   : > { %p807_p7 = pnand %p920_p2, %p919_p1  ;;  %s164_s15 = sshll.u32 %s154_s8, 4  ;;  %s165_s15 = int_to_ptr.vmem [resolvable:$true] %s164_s15 }
  0x33   : > { %s817_s19 = scalar_lea.hbm %s910_s1, %s454_s7  ;;  %s151_s28 = scalar_lea.sflag [#allocation6], %s757_s25 }
  0x34   : > { %s921_s30 = scalar_select %p807_p7, 1, 0 }
  0x35   : > { %s555_s3 = scalar_lea.hbm %s817_s19, 128  ;;  %s560_s20 = scalar_lea.hbm %s910_s1, 256 }
  0x36   : > { %p556_p9 = scmp.ne.s32.totalorder %s817_s19, %s555_s3  ;;  %p561_p3 = scmp.lt.u32.totalorder %s817_s19, %s910_s1 }
  0x37   : > { %p562_p6 = scmp.lt.u32.totalorder %s560_s20, %s555_s3  ;;  %p564_p10 = scmp.lt.u32.totalorder %s555_s3, %s817_s19 }
  0x38   : > { %p558_p11 = pnand %p556_p9, %p527_p5 }
  0x39   : > { %p563_p4 = por %p562_p6, %p561_p3 }
  0x3a   : > { %p559_p13 = pneg %p558_p11 }
  0x3b   : > { %p565_p12 = por %p564_p10, %p563_p4 }
  0x3d   : > { %p566_p1 = pnand %p565_p12, %p559_p13 }
  0x3f   : > { %569 = shalt.err (!%p566_p1)
}
  0x40   : > { %s570_s25 = scalar_lea.vmem %s165_s15, 128  ;;  %s674_s29 = smov [#allocation5]  }
  0x41   : > { %p571_p2 = scmp.ne.s32.totalorder %s165_s15, %s570_s25  ;;  %s575_s7 = sshll.u32 %s674_s29, 4  ;;  %s576_s7 = int_to_ptr.vmem [resolvable:$false] %s575_s7 }
  0x42   : > { %s577_s8 = scalar_lea.vmem %s576_s7, 256  ;;  %p578_p8 = scmp.lt.s32.totalorder %s165_s15, %s576_s7 }
  0x43   : > { %p573_p9 = pnand %p571_p2, %p527_p5  ;;  %p579_p7 = scmp.lt.s32.totalorder %s577_s8, %s570_s25 }
  0x45   : > { %p574_p11 = pneg %p573_p9  ;;  %p580_p3 = por %p579_p7, %p578_p8 }
  0x47   : > { %p581_p6 = pnand %p580_p3, %p574_p11 }
  0x49   : > { %584 = shalt.err (!%p581_p6)
}
  0x4a   : > { %468 = dma.hbm_to_vmem [thread:$0]  (!%p770_p0), %s817_s19, 128, %s165_s15, %s151_s28  }
  0x4b   : > { %p922_p13 = scmp.ne.s32.totalorder %s921_s30, 0 }
  0x4c   : > { %s842_s16 = sand.u32 (!%p922_p13), 1, %s655_s10   ;;  %p923_p5 = scmp.ne.s32.totalorder (!%p922_p13), %s915_s21, 0 }
  0x4d   : > { %173 = sbr.rel (%p922_p13) target bundleno = 326 (0x146), region = 28  ;;  %s176_s18 = scalar_lea.sflag (!%p922_p13), [#allocation3], %s842_s16 }
  0x4e   : > { %s178_s3 = scalar_lea.vmem (!%p922_p13), [#allocation2], %s842_s16 }
  0x54   : > { %638 = dma.done.wait (%p923_p5), %s176_s18, 16  }
  0x55   : > { %640 = vsyncadd (%p923_p5), %s176_s18, 4294967280  ;;  %s444_s4 = sshll.u32 %s842_s16, 3  ;;  %s184_s15 = scalar_lea.sflag [#allocation6], %s842_s16 }
  0x56   : > { %s187_s30 = scalar_lea.vmem [#allocation5], %s444_s4 }
  0x57   : > { %642 = dma.done.wait (%p923_p5), %s184_s15, 128  }
  0x58   : > { %644 = vsyncadd (%p923_p5), %s184_s15, 4294967168  ;;  %v675_v0 = vmov 0.0   ;;  %v214_v1 = vld [vmem:[%s187_s30] sm:$0xff]  ;;  %vm222_vm0 = vcmask 1043456   ;;  %v215_v3 = vld [vmem:[%s178_s3] sm:$0x1]  ;;  %v298_v4 = vlaneseq }
  0x59   : > { %291 = vmatprep.mubr.f32.mxu0 %v675_v0  ;;  %v217_v2 = vcombine.high %v214_v1, %v214_v1  ;;  %vm218_vm1 = vcmask 31744   ;;  %s455_s21 = sshll.u32 %s663_s12, 7  ;;  %s211_s19 = scalar_lea.vmem [#allocation7], %s444_s4 }
  0x5a   : > { %v299_v5 = vshrl.u32 %v298_v4, 7  ;;  %s331_s28 = sshll.u32 %s211_s19, 4  ;;  %s860_s20 = scalar_lea.hbm %s911_s2, %s455_s21  ;;  %s862_s28 = int_to_ptr.vmem [resolvable:$true] %s331_s28 }
  0x5b   : > { %446 = vmatprep.subr.msk.mxu0 %vm222_vm0, %v217_v2  ;;  %s315_s26 = scalar_lea.sflag [#allocation4], %s842_s16  ;;  %s585_s27 = scalar_lea.vmem %s862_s28, 128 }
  0x5c   : > { %447 = vmatpush1.msk.msra.mxu0 %vm222_vm0, %v214_v1  ;;  %v300_v6 = vsub.s32 0, %v299_v5  ;;  %p586_p8 = scmp.ne.s32.totalorder %s862_s28, %s585_s27  ;;  %p924_p0 = scmp.ne.s32.totalorder %s916_s22, 0 }
  0x5d   : > { %448 = vmatmul.mubr.msk.f32.vlgmr.msra.gmra.mrb[0].mxu0 %vm218_vm1, %v215_v3  ;;  %s676_s12 = smov [#allocation7]  }
  0x5e   : > { %p587_p7 = pnand %p586_p8, %p924_p0  ;;  %s589_s25 = sshll.u32 %s676_s12, 4  ;;  %s590_s25 = int_to_ptr.vmem [resolvable:$false] %s589_s25 }
  0x5f   : > { %s591_s29 = scalar_lea.vmem %s590_s25, 256  ;;  %p592_p10 = scmp.lt.s32.totalorder %s862_s28, %s590_s25 }
  0x60   : > { %p588_p4 = pneg %p587_p7  ;;  %p593_p12 = scmp.lt.s32.totalorder %s591_s29, %s585_s27 }
  0x62   : > { %p594_p1 = por %p593_p12, %p592_p10 }
  0x64   : > { %p595_p2 = pnand %p594_p1, %p588_p4 }
 0x130   : > { %v293_v7 = vpop.f32.mrb[0].mxu0 }
 0x131   : > { %v301_v8 = vrot.slane %v293_v7, %v300_v6  ;;  %v295_v9 = vpop.f32.mrb[1].mxu0 }
 0x132   : > { %v305_v10 = vrot.slane %v295_v9, %v300_v6 }
 0x133   : > { %v307_v11 = vmul.f32 %v301_v8, %v214_v1 }
 0x134   : > { %v308_v12 = vmul.f32 %v305_v10, %v217_v2 }
 0x136   : > { %v311_v13 = vcombine.low %v307_v11, %v308_v12 }
 0x138   : > { %313 = vst [vmem:[%s211_s19] sm:$0xff] %v311_v13 }
 0x139   : > { %598 = shalt.err (!%p595_p2)
}
 0x13a   : > { %s599_s7 = scalar_lea.hbm %s860_s20, 128  ;;  %s603_s18 = scalar_lea.hbm %s911_s2, 256 }
 0x13b   : > { %p600_p9 = scmp.ne.s32.totalorder %s860_s20, %s599_s7  ;;  %p604_p6 = scmp.lt.u32.totalorder %s860_s20, %s911_s2 }
 0x13c   : > { %p605_p13 = scmp.lt.u32.totalorder %s603_s18, %s599_s7  ;;  %p607_p8 = scmp.lt.u32.totalorder %s599_s7, %s860_s20 }
 0x13d   : > { %p601_p11 = pnand %p600_p9, %p924_p0 }
 0x13e   : > { %p606_p5 = por %p605_p13, %p604_p6 }
 0x13f   : > { %p602_p3 = pneg %p601_p11 }
 0x140   : > { %p608_p7 = por %p607_p8, %p606_p5 }
 0x142   : > { %p609_p4 = pnand %p608_p7, %p602_p3 }
 0x144   : > { %612 = shalt.err (!%p609_p4)
}
 0x145   : > { %460 = dma.vmem_to_hbm [thread:$0]  (%p924_p0), %s862_s28, 128, %s860_s20, %s315_s26  }
 0x146 PF: > { %s343_s15 = sand.u32 1, %s651_s9   ;;  %p925_p10 = scmp.ne.s32.totalorder %s917_s24, 0 }
 0x147   : > { %p926_p12 = scmp.ge.s32.totalorder %s671_s14, 2  ;;  %s344_s30 = scalar_lea.sflag [#allocation4], %s343_s15 }
 0x149   : > { %p470_p1 = pnand %p926_p12, %p925_p10 }
 0x14b   : > { %646 = dma.done.wait (!%p470_p1), %s344_s30, 128  }
 0x14c   : > { %648 = vsyncadd (!%p470_p1), %s344_s30, 4294967168  ;;  %s21_s14 = sadd.s32 1, %s671_s14   ;;  %s927_s9 = smov %s655_s10 }
 0x14d   : > { %p18_p2 = scmp.ge.s32.totalorder %s21_s14, 4   ;;  %s928_s10 = smov %s659_s11 }
 0x14e   : > { %s929_s11 = smov %s748_s23  ;;  %s930_s12 = smov %s667_s13 }
 0x14f   : > { %s931_s13 = smov %s933_s17  ;;  %20 = sbr.rel (!%p18_p2) target bundleno = 8 (0x8), region = 86 }
 0x156   :  { %349 = vsyncpa [#allocation3], 1 }
 0x157   :  { %351 = vsyncpa [#allocation3 + $0x1], 1 }
 0x158   :  { %352 = vsyncpa [#allocation6], 1 }
 0x159   :  { %354 = vsyncpa [#allocation6 + $0x1], 1 }
 0x15a   :  { %355 = vsyncpa [#allocation4], 1 }
 0x15b   :  { %357 = vsyncpa [#allocation4 + $0x1], 1 }

</bundles_post_ra>
